<compile_context>
chip_gen: v5e
topology: v5e:2x2
jax: 0.10.0
libtpu: 0.0.40
codegen_flags: <defaults>
</compile_context>

<pallas_src>
import functools

import jax
import jax.numpy as jnp
from jax.experimental import pallas as pl
from jax.experimental.pallas import tpu as pltpu


def conv1d_glu_kernel(xw_ref, w1_ref, w2_ref, b1_ref, b2_ref, o_ref, *,
                      kernel_size, pad, t_tile):
    """One (batch, time-tile) grid step.

    xw_ref: (1, 1, C_in, t_tile + 2*pad)  framed input tile (with conv halo), f32
    w1_ref: (K, C_out, C_in)              conv weight, GLU "value" half, bf16
    w2_ref: (K, C_out, C_in)              conv weight, GLU "gate"  half, bf16
    b1_ref: (C_out, 1)                    conv bias halves, f32
    b2_ref: (C_out, 1)
    o_ref : (1, C_out, t_tile)            output tile
    """
    c_out = o_ref.shape[1]
    xw = xw_ref[0, 0]                                   # (C_in, t_tile + 2*pad)

    acc1 = jnp.zeros((c_out, t_tile), jnp.float32)
    acc2 = jnp.zeros((c_out, t_tile), jnp.float32)
    residual = None
    for kk in range(kernel_size):                       # static, K is small
        # Shifted conv window: static lane slice (XLU rotate, ~ pltpu.roll).
        win = xw[:, kk:kk + t_tile]                     # (C_in, t_tile), f32
        if kk == pad:                                   # unshifted window == x
            residual = win
        win_bf = win.astype(jnp.bfloat16)
        acc1 += jnp.dot(w1_ref[kk], win_bf, preferred_element_type=jnp.float32)
        acc2 += jnp.dot(w2_ref[kk], win_bf, preferred_element_type=jnp.float32)

    acc1 += b1_ref[...]                                 # (C_out, 1) -> broadcast over lanes
    acc2 += b2_ref[...]

    gate = 1.0 / (1.0 + jnp.exp(-acc2))                 # sigmoid (exp on the EUP)
    glu = acc1 * gate
    # TODO(synk): dropout is identity here (inference / p_dropout treated as 0).
    o_ref[0] = (residual + glu).astype(o_ref.dtype)


def _pick_t_tile(T):
    # Prefer >=2 lane-dense (multiple of 128) tiles per batch element so the
    # BlockSpec pipeline has steps to overlap; else fall back to whole-T.
    for cand in (512, 256, 128):
        if T % cand == 0 and T // cand >= 2:
            return cand
    return T


def conv1d_glu_forward(x, weight, bias, *, kernel_size, dropout_p=0.0, t_tile=None):
    """Conv1dGLU forward.

    x      : (B, C, T)        float32, NCT layout (same as torch)
    weight : (2*C, C, K)      torch Conv1d weight layout (out, in, k)
    bias   : (2*C,)
    """
    del dropout_p  # identity at inference
    B, C_in, T = x.shape
    two_c, c_in_w, K = weight.shape
    assert K == kernel_size and kernel_size % 2 == 1
    assert c_in_w == C_in and two_c == 2 * C_in, "residual requires C_out == C_in"
    C_out = two_c // 2
    pad = (kernel_size - 1) // 2

    if t_tile is None:
        t_tile = _pick_t_tile(T)
    assert T % t_tile == 0 and (t_tile % 128 == 0 or t_tile == T)
    n_t = T // t_tile

    # Frame the padded input into per-tile windows (carrying the conv halo) so
    # every Pallas block is a plain non-overlapping block: (B, nT, C, tT+2*pad).
    x_pad = jnp.pad(x, ((0, 0), (0, 0), (pad, pad)))
    frames = jnp.stack(
        [x_pad[:, :, t * t_tile: t * t_tile + t_tile + 2 * pad] for t in range(n_t)],
        axis=1)

    # Pre-split the conv weight into the GLU halves, (K, C_out, C_in) layout,
    # pre-cast to bf16 for the MXU (accumulation stays f32). Bias stays f32.
    w1 = jnp.transpose(weight[:C_out], (2, 0, 1)).astype(jnp.bfloat16)
    w2 = jnp.transpose(weight[C_out:], (2, 0, 1)).astype(jnp.bfloat16)
    b1 = bias[:C_out].astype(jnp.float32).reshape(C_out, 1)
    b2 = bias[C_out:].astype(jnp.float32).reshape(C_out, 1)

    kernel = functools.partial(conv1d_glu_kernel,
                               kernel_size=kernel_size, pad=pad, t_tile=t_tile)

    out = pl.pallas_call(
        kernel,
        out_shape=jax.ShapeDtypeStruct((B, C_out, T), x.dtype),
        grid=(B, n_t),
        in_specs=[
            pl.BlockSpec((1, 1, C_in, t_tile + 2 * pad), lambda b, t: (b, t, 0, 0)),
            pl.BlockSpec((K, C_out, C_in), lambda b, t: (0, 0, 0)),
            pl.BlockSpec((K, C_out, C_in), lambda b, t: (0, 0, 0)),
            pl.BlockSpec((C_out, 1), lambda b, t: (0, 0)),
            pl.BlockSpec((C_out, 1), lambda b, t: (0, 0)),
        ],
        out_specs=pl.BlockSpec((1, C_out, t_tile), lambda b, t: (b, 0, t)),
        compiler_params=pltpu.CompilerParams(
            dimension_semantics=("parallel", "parallel"),
            vmem_limit_bytes=32 * 1024 * 1024),
    )(frames, w1, w2, b1, b2)
    return out


def _reference(x, weight, bias, kernel_size):
    """Plain-JAX Conv1dGLU with bf16-rounded conv operands (matches the kernel)."""
    B, C, T = x.shape
    pad = (kernel_size - 1) // 2
    c_out = weight.shape[0] // 2
    xq = jnp.pad(x, ((0, 0), (0, 0), (pad, pad))).astype(jnp.bfloat16).astype(jnp.float32)
    wq = weight.astype(jnp.bfloat16).astype(jnp.float32)
    conv = bias[None, :, None] + sum(
        jnp.einsum("oc,bct->bot", wq[:, :, k], xq[:, :, k:k + T])
        for k in range(kernel_size))
    x1, x2 = conv[:, :c_out], conv[:, c_out:]
    return x + x1 * (1.0 / (1.0 + jnp.exp(-x2)))


if __name__ == "__main__":
    B, C, T, K = 2, 32, 512, 5

    key = jax.random.PRNGKey(0)
    kx, kw, kb = jax.random.split(key, 3)
    x = jax.random.normal(kx, (B, C, T), jnp.float32)
    weight = (1.0 / jnp.sqrt(C * K)) * jax.random.normal(kw, (2 * C, C, K), jnp.float32)
    bias = 0.1 * jax.random.normal(kb, (2 * C,), jnp.float32)

    y = conv1d_glu_forward(x, weight, bias, kernel_size=K)
    jax.block_until_ready(y)
    assert y.shape == (B, C, T)

    y_ref = _reference(x, weight, bias, K)
    max_err = float(jnp.max(jnp.abs(y - y_ref)))
    assert max_err < 5e-3, f"mismatch vs plain-JAX reference: {max_err}"

    print("KERNEL_OK")
</pallas_src>

<mosaic_0001>
module attributes {stable_mosaic.version = 11 : i64} {
  func.func @conv1d_glu_kernel(%arg0: i32, %arg1: i32, %arg2: memref<1x1x32x260xf32, #tpu.memory_space<vmem>>, %arg3: memref<5x32x32xbf16, #tpu.memory_space<vmem>>, %arg4: memref<5x32x32xbf16, #tpu.memory_space<vmem>>, %arg5: memref<32x1xf32, #tpu.memory_space<vmem>>, %arg6: memref<32x1xf32, #tpu.memory_space<vmem>>, %arg7: memref<1x32x256xf32, #tpu.memory_space<vmem>>) attributes {dimension_semantics = [#tpu.dimension_semantics<parallel>, #tpu.dimension_semantics<parallel>], iteration_bounds = array<i64: 2, 2>, scalar_prefetch = 0 : i64, scratch_operands = 0 : i64, tpu.core_type = #tpu.core_type<tc>, window_params = [{transform_indices = @transform_0, window_bounds = array<i64: 1, 1, 32, 260>}, {pipeline_mode = #tpu.pipeline_mode<synchronous>, transform_indices = @transform_1, window_bounds = array<i64: 5, 32, 32>}, {pipeline_mode = #tpu.pipeline_mode<synchronous>, transform_indices = @transform_2, window_bounds = array<i64: 5, 32, 32>}, {pipeline_mode = #tpu.pipeline_mode<synchronous>, transform_indices = @transform_3, window_bounds = array<i64: 32, 1>}, {pipeline_mode = #tpu.pipeline_mode<synchronous>, transform_indices = @transform_4, window_bounds = array<i64: 32, 1>}, {transform_indices = @transform_5, window_bounds = array<i64: 1, 32, 256>}]} {
    %c0 = arith.constant 0 : index
    %c0_0 = arith.constant 0 : index
    %c0_1 = arith.constant 0 : index
    %c0_2 = arith.constant 0 : index
    %0 = vector.load %arg2[%c0, %c0_0, %c0_1, %c0_2] : memref<1x1x32x260xf32, #tpu.memory_space<vmem>>, vector<1x1x32x260xf32>
    %1 = vector.shape_cast %0 : vector<1x1x32x260xf32> to vector<32x260xf32>
    %cst = arith.constant 0.000000e+00 : f32
    %2 = vector.broadcast %cst : f32 to vector<32x256xf32>
    %cst_3 = arith.constant 0.000000e+00 : f32
    %3 = vector.broadcast %cst_3 : f32 to vector<32x256xf32>
    %4 = vector.extract_strided_slice %1 {offsets = [0, 0], sizes = [32, 256], strides = [1, 1]} : vector<32x260xf32> to vector<32x256xf32>
    %5 = arith.truncf %4 : vector<32x256xf32> to vector<32x256xbf16>
    %c0_4 = arith.constant 0 : index
    %c0_5 = arith.constant 0 : index
    %c0_6 = arith.constant 0 : index
    %6 = vector.load %arg3[%c0_4, %c0_5, %c0_6] : memref<5x32x32xbf16, #tpu.memory_space<vmem>>, vector<1x32x32xbf16>
    %7 = vector.shape_cast %6 : vector<1x32x32xbf16> to vector<32x32xbf16>
    %cst_7 = arith.constant dense<0.000000e+00> : vector<32x256xf32>
    %8 = tpu.matmul %7, %5, %cst_7 {dimension_numbers = #tpu.dot_dimension_numbers<[1], [0], [0], [1], [0, 0, 1, 1], [], []>} : vector<32x32xbf16>, vector<32x256xbf16>, vector<32x256xf32> -> vector<32x256xf32>
    %9 = arith.addf %2, %8 : vector<32x256xf32>
    %c0_8 = arith.constant 0 : index
    %c0_9 = arith.constant 0 : index
    %c0_10 = arith.constant 0 : index
    %10 = vector.load %arg4[%c0_8, %c0_9, %c0_10] : memref<5x32x32xbf16, #tpu.memory_space<vmem>>, vector<1x32x32xbf16>
    %11 = vector.shape_cast %10 : vector<1x32x32xbf16> to vector<32x32xbf16>
    %cst_11 = arith.constant dense<0.000000e+00> : vector<32x256xf32>
    %12 = tpu.matmul %11, %5, %cst_11 {dimension_numbers = #tpu.dot_dimension_numbers<[1], [0], [0], [1], [0, 0, 1, 1], [], []>} : vector<32x32xbf16>, vector<32x256xbf16>, vector<32x256xf32> -> vector<32x256xf32>
    %13 = arith.addf %3, %12 : vector<32x256xf32>
    %14 = vector.extract_strided_slice %1 {offsets = [0, 1], sizes = [32, 256], strides = [1, 1]} : vector<32x260xf32> to vector<32x256xf32>
    %15 = arith.truncf %14 : vector<32x256xf32> to vector<32x256xbf16>
    %c1 = arith.constant 1 : index
    %c0_12 = arith.constant 0 : index
    %c0_13 = arith.constant 0 : index
    %16 = vector.load %arg3[%c1, %c0_12, %c0_13] : memref<5x32x32xbf16, #tpu.memory_space<vmem>>, vector<1x32x32xbf16>
    %17 = vector.shape_cast %16 : vector<1x32x32xbf16> to vector<32x32xbf16>
    %cst_14 = arith.constant dense<0.000000e+00> : vector<32x256xf32>
    %18 = tpu.matmul %17, %15, %cst_14 {dimension_numbers = #tpu.dot_dimension_numbers<[1], [0], [0], [1], [0, 0, 1, 1], [], []>} : vector<32x32xbf16>, vector<32x256xbf16>, vector<32x256xf32> -> vector<32x256xf32>
    %19 = arith.addf %9, %18 : vector<32x256xf32>
    %c1_15 = arith.constant 1 : index
    %c0_16 = arith.constant 0 : index
    %c0_17 = arith.constant 0 : index
    %20 = vector.load %arg4[%c1_15, %c0_16, %c0_17] : memref<5x32x32xbf16, #tpu.memory_space<vmem>>, vector<1x32x32xbf16>
    %21 = vector.shape_cast %20 : vector<1x32x32xbf16> to vector<32x32xbf16>
    %cst_18 = arith.constant dense<0.000000e+00> : vector<32x256xf32>
    %22 = tpu.matmul %21, %15, %cst_18 {dimension_numbers = #tpu.dot_dimension_numbers<[1], [0], [0], [1], [0, 0, 1, 1], [], []>} : vector<32x32xbf16>, vector<32x256xbf16>, vector<32x256xf32> -> vector<32x256xf32>
    %23 = arith.addf %13, %22 : vector<32x256xf32>
    %24 = vector.extract_strided_slice %1 {offsets = [0, 2], sizes = [32, 256], strides = [1, 1]} : vector<32x260xf32> to vector<32x256xf32>
    %25 = arith.truncf %24 : vector<32x256xf32> to vector<32x256xbf16>
    %c2 = arith.constant 2 : index
    %c0_19 = arith.constant 0 : index
    %c0_20 = arith.constant 0 : index
    %26 = vector.load %arg3[%c2, %c0_19, %c0_20] : memref<5x32x32xbf16, #tpu.memory_space<vmem>>, vector<1x32x32xbf16>
    %27 = vector.shape_cast %26 : vector<1x32x32xbf16> to vector<32x32xbf16>
    %cst_21 = arith.constant dense<0.000000e+00> : vector<32x256xf32>
    %28 = tpu.matmul %27, %25, %cst_21 {dimension_numbers = #tpu.dot_dimension_numbers<[1], [0], [0], [1], [0, 0, 1, 1], [], []>} : vector<32x32xbf16>, vector<32x256xbf16>, vector<32x256xf32> -> vector<32x256xf32>
    %29 = arith.addf %19, %28 : vector<32x256xf32>
    %c2_22 = arith.constant 2 : index
    %c0_23 = arith.constant 0 : index
    %c0_24 = arith.constant 0 : index
    %30 = vector.load %arg4[%c2_22, %c0_23, %c0_24] : memref<5x32x32xbf16, #tpu.memory_space<vmem>>, vector<1x32x32xbf16>
    %31 = vector.shape_cast %30 : vector<1x32x32xbf16> to vector<32x32xbf16>
    %cst_25 = arith.constant dense<0.000000e+00> : vector<32x256xf32>
    %32 = tpu.matmul %31, %25, %cst_25 {dimension_numbers = #tpu.dot_dimension_numbers<[1], [0], [0], [1], [0, 0, 1, 1], [], []>} : vector<32x32xbf16>, vector<32x256xbf16>, vector<32x256xf32> -> vector<32x256xf32>
    %33 = arith.addf %23, %32 : vector<32x256xf32>
    %34 = vector.extract_strided_slice %1 {offsets = [0, 3], sizes = [32, 256], strides = [1, 1]} : vector<32x260xf32> to vector<32x256xf32>
    %35 = arith.truncf %34 : vector<32x256xf32> to vector<32x256xbf16>
    %c3 = arith.constant 3 : index
    %c0_26 = arith.constant 0 : index
    %c0_27 = arith.constant 0 : index
    %36 = vector.load %arg3[%c3, %c0_26, %c0_27] : memref<5x32x32xbf16, #tpu.memory_space<vmem>>, vector<1x32x32xbf16>
    %37 = vector.shape_cast %36 : vector<1x32x32xbf16> to vector<32x32xbf16>
    %cst_28 = arith.constant dense<0.000000e+00> : vector<32x256xf32>
    %38 = tpu.matmul %37, %35, %cst_28 {dimension_numbers = #tpu.dot_dimension_numbers<[1], [0], [0], [1], [0, 0, 1, 1], [], []>} : vector<32x32xbf16>, vector<32x256xbf16>, vector<32x256xf32> -> vector<32x256xf32>
    %39 = arith.addf %29, %38 : vector<32x256xf32>
    %c3_29 = arith.constant 3 : index
    %c0_30 = arith.constant 0 : index
    %c0_31 = arith.constant 0 : index
    %40 = vector.load %arg4[%c3_29, %c0_30, %c0_31] : memref<5x32x32xbf16, #tpu.memory_space<vmem>>, vector<1x32x32xbf16>
    %41 = vector.shape_cast %40 : vector<1x32x32xbf16> to vector<32x32xbf16>
    %cst_32 = arith.constant dense<0.000000e+00> : vector<32x256xf32>
    %42 = tpu.matmul %41, %35, %cst_32 {dimension_numbers = #tpu.dot_dimension_numbers<[1], [0], [0], [1], [0, 0, 1, 1], [], []>} : vector<32x32xbf16>, vector<32x256xbf16>, vector<32x256xf32> -> vector<32x256xf32>
    %43 = arith.addf %33, %42 : vector<32x256xf32>
    %44 = vector.extract_strided_slice %1 {offsets = [0, 4], sizes = [32, 256], strides = [1, 1]} : vector<32x260xf32> to vector<32x256xf32>
    %45 = arith.truncf %44 : vector<32x256xf32> to vector<32x256xbf16>
    %c4 = arith.constant 4 : index
    %c0_33 = arith.constant 0 : index
    %c0_34 = arith.constant 0 : index
    %46 = vector.load %arg3[%c4, %c0_33, %c0_34] : memref<5x32x32xbf16, #tpu.memory_space<vmem>>, vector<1x32x32xbf16>
    %47 = vector.shape_cast %46 : vector<1x32x32xbf16> to vector<32x32xbf16>
    %cst_35 = arith.constant dense<0.000000e+00> : vector<32x256xf32>
    %48 = tpu.matmul %47, %45, %cst_35 {dimension_numbers = #tpu.dot_dimension_numbers<[1], [0], [0], [1], [0, 0, 1, 1], [], []>} : vector<32x32xbf16>, vector<32x256xbf16>, vector<32x256xf32> -> vector<32x256xf32>
    %49 = arith.addf %39, %48 : vector<32x256xf32>
    %c4_36 = arith.constant 4 : index
    %c0_37 = arith.constant 0 : index
    %c0_38 = arith.constant 0 : index
    %50 = vector.load %arg4[%c4_36, %c0_37, %c0_38] : memref<5x32x32xbf16, #tpu.memory_space<vmem>>, vector<1x32x32xbf16>
    %51 = vector.shape_cast %50 : vector<1x32x32xbf16> to vector<32x32xbf16>
    %cst_39 = arith.constant dense<0.000000e+00> : vector<32x256xf32>
    %52 = tpu.matmul %51, %45, %cst_39 {dimension_numbers = #tpu.dot_dimension_numbers<[1], [0], [0], [1], [0, 0, 1, 1], [], []>} : vector<32x32xbf16>, vector<32x256xbf16>, vector<32x256xf32> -> vector<32x256xf32>
    %53 = arith.addf %43, %52 : vector<32x256xf32>
    %c0_40 = arith.constant 0 : index
    %c0_41 = arith.constant 0 : index
    %54 = vector.load %arg5[%c0_40, %c0_41] : memref<32x1xf32, #tpu.memory_space<vmem>>, vector<32x1xf32>
    %55 = vector.broadcast %54 : vector<32x1xf32> to vector<32x256xf32>
    %56 = arith.addf %49, %55 : vector<32x256xf32>
    %c0_42 = arith.constant 0 : index
    %c0_43 = arith.constant 0 : index
    %57 = vector.load %arg6[%c0_42, %c0_43] : memref<32x1xf32, #tpu.memory_space<vmem>>, vector<32x1xf32>
    %58 = vector.broadcast %57 : vector<32x1xf32> to vector<32x256xf32>
    %59 = arith.addf %53, %58 : vector<32x256xf32>
    %cst_44 = arith.constant 0.000000e+00 : f32
    %60 = vector.broadcast %cst_44 : f32 to vector<32x256xf32>
    %61 = arith.subf %60, %59 : vector<32x256xf32>
    %62 = math.exp %61 : vector<32x256xf32>
    %cst_45 = arith.constant 1.000000e+00 : f32
    %63 = vector.broadcast %cst_45 : f32 to vector<32x256xf32>
    %64 = arith.addf %63, %62 : vector<32x256xf32>
    %cst_46 = arith.constant 1.000000e+00 : f32
    %65 = vector.broadcast %cst_46 : f32 to vector<32x256xf32>
    %66 = arith.divf %65, %64 : vector<32x256xf32>
    %67 = arith.mulf %56, %66 : vector<32x256xf32>
    %68 = arith.addf %24, %67 : vector<32x256xf32>
    %c0_47 = arith.constant 0 : index
    %c0_48 = arith.constant 0 : index
    %c0_49 = arith.constant 0 : index
    %69 = vector.load %arg7[%c0_47, %c0_48, %c0_49] : memref<1x32x256xf32, #tpu.memory_space<vmem>>, vector<1x32x256xf32>
    %70 = vector.shape_cast %69 : vector<1x32x256xf32> to vector<32x256xf32>
    %71 = vector.shape_cast %68 : vector<32x256xf32> to vector<1x32x256xf32>
    tpu.vector_store %arg7[%c0_47, %c0_48, %c0_49], %71 {strides = array<i32>} : memref<1x32x256xf32, #tpu.memory_space<vmem>>, vector<1x32x256xf32>,
    return
  }
  func.func @transform_0(%arg0: i32, %arg1: i32) -> (i32, i32, i32, i32) {
    %c0_i32 = arith.constant 0 : i32
    %c0_i32_0 = arith.constant 0 : i32
    %c0_i32_1 = arith.constant 0 : i32
    return %arg0, %arg1, %c0_i32, %c0_i32_0 : i32, i32, i32, i32
  }
  func.func @transform_1(%arg0: i32, %arg1: i32) -> (i32, i32, i32) {
    %c0_i32 = arith.constant 0 : i32
    %c0_i32_0 = arith.constant 0 : i32
    %c0_i32_1 = arith.constant 0 : i32
    %c0_i32_2 = arith.constant 0 : i32
    return %c0_i32, %c0_i32_0, %c0_i32_1 : i32, i32, i32
  }
  func.func @transform_2(%arg0: i32, %arg1: i32) -> (i32, i32, i32) {
    %c0_i32 = arith.constant 0 : i32
    %c0_i32_0 = arith.constant 0 : i32
    %c0_i32_1 = arith.constant 0 : i32
    %c0_i32_2 = arith.constant 0 : i32
    return %c0_i32, %c0_i32_0, %c0_i32_1 : i32, i32, i32
  }
  func.func @transform_3(%arg0: i32, %arg1: i32) -> (i32, i32) {
    %c0_i32 = arith.constant 0 : i32
    %c0_i32_0 = arith.constant 0 : i32
    %c0_i32_1 = arith.constant 0 : i32
    return %c0_i32, %c0_i32_0 : i32, i32
  }
  func.func @transform_4(%arg0: i32, %arg1: i32) -> (i32, i32) {
    %c0_i32 = arith.constant 0 : i32
    %c0_i32_0 = arith.constant 0 : i32
    %c0_i32_1 = arith.constant 0 : i32
    return %c0_i32, %c0_i32_0 : i32, i32
  }
  func.func @transform_5(%arg0: i32, %arg1: i32) -> (i32, i32, i32) {
    %c0_i32 = arith.constant 0 : i32
    %c0_i32_0 = arith.constant 0 : i32
    return %arg0, %c0_i32, %arg1 : i32, i32, i32
  }
}

</mosaic_0001>

<bundles_post_ra>
// kernel: tpu_custom_call.1
= control target key start
LH: loop header
LB: loop body
LE: loop exit
PB: predicated region body
PF: predicated region fallthrough
CT: control target
= control target key end

     0   :  { %s2696_s0 = inlined_call_operand.hbm [shape: f32[2,2,32,260], index: 0, kind: input, shape index: {}]   ;;  %s2697_s1 = inlined_call_operand.hbm [shape: bf16[5,32,32], index: 1, kind: input, shape index: {}]   ;;  %s2698_s2 = inlined_call_operand.hbm [shape: bf16[5,32,32], index: 2, kind: input, shape index: {}]   ;;  %s2699_s3 = inlined_call_operand.vmem [shape: f32[32,1], index: 3, kind: input, shape index: {}]   ;;  %s2700_s4 = inlined_call_operand.vmem [shape: f32[32,1], index: 4, kind: input, shape index: {}]   ;;  %s2701_s5 = inlined_call_operand.hbm [shape: f32[2,32,512], index: 5, kind: output, shape index: {}]  }
   0x1   :  { %2712 = sst [smem:[#allocation23_spill]] %s2697_s1 }
   0x2   :  { %2713 = sst [smem:[#allocation24_spill]] %s2698_s2 }
   0x3   :  { %2714 = sst [smem:[#allocation25_spill]] %s2701_s5 }
   0x4   :  { %10 = vsyncpa [#allocation3], 0 }
   0x5   :  { %12 = vsyncpa [#allocation3 + $0x1], 0 }
   0x6   :  { %13 = vsyncpa [#allocation6], 0 }
   0x7   :  { %14 = vsyncpa [#allocation4], 0 }
   0x8   :  { %16 = vsyncpa [#allocation4 + $0x1], 0  ;;  %s2067_s18 = smov 0   ;;  %s2069_s19 = smov 0  }
   0x9   :  { %s2071_s20 = smov 0   ;;  %s2073_s21 = smov 0  }
   0xa   :  { %s2075_s22 = smov 0   ;;  %s2077_s23 = smov 0  }
   0xb   :  { %s2079_s24 = smov 0   ;;  %s2081_s25 = smov 0  }
   0xc LB: > { %2715 = sst [smem:[#allocation12_spill]] %s1992_s18  ;;  %s1508_s26 = sadd.s32 4294967295, %s2020_s25   ;;  %s2020_s25 = sphi %s2081_s25, %s22_s25   ;;  %s2016_s24 = sphi %s2079_s24, %s2767_s24   ;;  %s2012_s23 = sphi %s2077_s23, %s2761_s23   ;;  %s2008_s22 = sphi %s2075_s22, %s2766_s22   ;;  %s2004_s21 = sphi %s2073_s21, %s2760_s21   ;;  %s2000_s20 = sphi %s2071_s20, %s2765_s20   ;;  %s1996_s19 = sphi %s2069_s19, %s2764_s19   ;;  %s1992_s18 = sphi %s2067_s18, %s2763_s18  }
   0xd   : > { %2716 = sst [smem:[#allocation13_spill]] %s2012_s23  ;;  %s1509_s27 = sadd.s32 4294967294, %s2020_s25  }
   0xe   : > { %2717 = sst [smem:[#allocation14_spill]] %s2020_s25  ;;  %p56_p0 = scmp.ne.s32.totalorder %s1996_s19, %s1992_s18 }
   0xf   : > { %p2111_p1 = scmp.eq.s32.totalorder %s1508_s26, 0  ;;  %p2115_p2 = scmp.eq.s32.totalorder %s1508_s26, 3 }
  0x10   : > { %p172_p3 = scmp.eq.s32.totalorder %s1509_s27, 3  ;;  %p1510_p5 = scmp.ge.s32.totalorder %s2020_s25, 1 }
  0x11   : > { %p2121_p4 = por %p2111_p1, %p56_p0  ;;  %p179_p7 = scmp.lt.s32.totalorder %s2020_s25, 5 }
  0x12   : > { %p2126_p6 = por %p172_p3, %p56_p0  ;;  %s2723_s1 = sld [smem:[#allocation23_spill]] }
  0x13   : > { %p2134_p8 = pnand %p1510_p5, %p179_p7  ;;  %s2022_s11 = smov [#allocation5]  }
  0x14   : > { %s2721_s6 = scalar_select %p2126_p6, 1, 0 }
  0x15   : > { %p1681_p9 = pneg %p2134_p8  ;;  %s192_s12 = sshll.u32 %s2022_s11, 4  ;;  %s193_s12 = int_to_ptr.vmem [resolvable:$true] %s192_s12 }
  0x16   : > { %2722 = sst [smem:[#allocation15_spill]] %s2721_s6  ;;  %s2023_s16 = smov 64  }
  0x17   : > { %p1682_p10 = pnand %p1681_p9, %p2111_p1  ;;  %s2725_s2 = sld [smem:[#allocation24_spill]] }
  0x18   : > { %s190_s9 = sshll.u32 %s2723_s1, 4  ;;  %s2024_s17 = smov 4   ;;  %s191_s9 = int_to_ptr.hbm [resolvable:$true] %s190_s9 }
  0x19   : > { %1684 = dma.hbm_to_vmem [thread:$0]  (!%p1682_p10), %s191_s9, 1280, %s193_s12, [#allocation6], %s2023_s16, %s2023_s16, %s2024_s17  }
  0x1a   : > { %s2025_s26 = smov [#allocation7]   ;;  %s31_s7 = sadd.s32 1, %s2012_s23 }
  0x1b   : > { %s206_s27 = sshll.u32 %s2025_s26, 4  ;;  %s34_s8 = sadd.s32 1, %s2016_s24  ;;  %s207_s27 = int_to_ptr.vmem [resolvable:$true] %s206_s27 }
  0x1c   : > { %p32_p11 = scmp.ge.s32.totalorder %s31_s7, 2  ;;  %s43_s11 = sadd.s32 1, %s2000_s20 }
  0x1d   : > { %s204_s15 = sshll.u32 %s2725_s2, 4  ;;  %p50_p12 = scmp.ne.s32.totalorder %s2000_s20, %s1996_s19  ;;  %s205_s15 = int_to_ptr.hbm [resolvable:$true] %s204_s15 }
  0x1e   : > { %1687 = dma.hbm_to_vmem [thread:$0]  (!%p1682_p10), %s205_s15, 1280, %s207_s27, [#allocation6], %s2023_s16, %s2023_s16, %s2024_s17  }
  0x1f   : > { %p51_p13 = scmp.eq.s32.totalorder %s2020_s25, 0  ;;  %s2769_s7 = smov (%p32_p11, %s31_s7), 0 }
  0x20   : > { %2726 = sst [smem:[#allocation16_spill]] %s2769_s7  ;;  %s2771_s8 = smov (!%p32_p11, %s34_s8), %s2016_s24 }
  0x21   : > { %s39_s9 = ssub.s32 %s2012_s23, %s2769_s7  ;;  %p2156_p0 = por %p51_p13, %p50_p12 }
  0x22   : > { %p36_p3 = scmp.ge.s32.totalorder %s2771_s8, 2  ;;  %p2162_p5 = por %p2115_p2, %p50_p12 }
  0x23   : > { %p1698_p7 = scmp.lt.s32.totalorder %s2020_s25, 4  ;;  %s226_s14 = sand.u32 1, %s2000_s20  }
  0x24   : > { %s2728_s13 = scalar_select %p2162_p5, 1, 0 }
  0x25   : > { %s2773_s8 = smov (%p36_p3, %s2771_s8), 0  ;;  %s1665_s15 = smul.u32 96, %s226_s14 }
  0x26   : > { %2729 = sst [smem:[#allocation17_spill]] %s2728_s13  ;;  %s38_s16 = ssub.s32 %s2016_s24, %s2773_s8 }
  0x27   : > { %2730 = sst [smem:[#allocation18_spill]] %s2773_s8  ;;  %s1666_s17 = smul.u32 12, %s2012_s23 }
  0x28   : > { %s40_s26 = sor.u32 %s39_s9, %s38_s16  ;;  %s1667_s27 = smul.u32 24, %s2016_s24 }
  0x29   : > { %p41_p9 = scmp.eq.s32.totalorder %s40_s26, 0  ;;  %s230_s1 = scalar_lea.vmem [#allocation2], %s1665_s15 }
  0x2a   : > { %s240_s2 = sshll.u32 %s230_s1, 4  ;;  %p1689_p10 = pnand %p1698_p7, %p2156_p0  ;;  %s241_s2 = int_to_ptr.vmem [resolvable:$true] %s240_s2 }
  0x2b   : > { %s2177_s29 = scalar_select %p41_p9, %s2000_s20, %s43_s11  }
  0x2c   : > { %s235_s7 = sadd.s32 %s1667_s27, %s1666_s17  ;;  %s227_s8 = scalar_lea.sflag [#allocation3], %s226_s14 }
  0x2d   : > { %s1514_s6 = sshll.u32 %s235_s7, 3  ;;  %s2026_s23 = smov 384  }
  0x2e   : > { %s237_s13 = scalar_lea.hbm %s2696_s0, %s1514_s6  ;;  %s2027_s9 = smov 24  }
  0x2f   : > { %s238_s5 = sshll.u32 %s237_s13, 4  ;;  %252 = sbr.rel (%p2134_p8) target bundleno = 719 (0x2cf), region = 40  ;;  %s239_s5 = int_to_ptr.hbm [resolvable:$true] %s238_s5 }
  0x30   : > { %1691 = dma.hbm_to_vmem [thread:$0]  (!%p1689_p10), %s239_s5, 1536, %s241_s2, %s227_s8, %s2026_s23, %s2026_s23, %s2027_s9  }
  0x34   : > { %s2185_s1 = sand.u32 1, %s1996_s19  }
  0x35   : > { %s1668_s7 = smul.u32 96, %s2185_s1  ;;  %s255_s11 = scalar_lea.sflag [#allocation3], %s2185_s1 }
  0x37   : > { %s2189_s12 = scalar_lea.vmem [#allocation2], %s1668_s7 }
  0x38   : > { %1979 = dma.done.wait (%p2121_p4), %s255_s11, 1536  }
  0x39   : > { %1981 = vsyncadd (%p2121_p4), %s255_s11, 4294965760 }
  0x3a   : > { %1983 = dma.done.wait (%p2111_p1), [#allocation6], 2560  }
  0x3b   : > { %1985 = vsyncadd (%p2111_p1), [#allocation6], 4294964736  ;;  %v306_v0 = vld [vmem:[%s2189_s12 + $0x40] sm:$0xff]  ;;  %v309_v1 = vld [vmem:[%s2189_s12 + $0x58] sm:$0xff]  ;;  %s2028_s2 = smov 127   ;;  %vm366_vm0 = vcmask 261120  }
  0x3c   : > { %v304_v2 = vld [vmem:[%s2189_s12 + $0x30] sm:$0xff]  ;;  %v323_v3 = vpack.c.bf16 %v309_v1, %v306_v0  ;;  %v307_v4 = vld [vmem:[%s2189_s12 + $0x48] sm:$0xff]  ;;  %v305_v5 = vld [vmem:[%s2189_s12 + $0x38] sm:$0xff]  ;;  %s2029_s5 = smov 126   ;;  %s2030_s18 = smov 125   ;;  %vm357_vm1 = vcmask 1039360  }
  0x3d   : > { %v308_v6 = vld [vmem:[%s2189_s12 + $0x50] sm:$0xff]  ;;  %v312_v7 = vpack.c.bf16 %v307_v4, %v304_v2  ;;  %v299_v8 = vld [vmem:[%s2189_s12 + $0x8] sm:$0xff]  ;;  %v298_v10 = vld [vmem:[%s2189_s12] sm:$0xff]  ;;  %s2031_s23 = smov 124   ;;  %vm605_vm2 = vcmask 1031168   ;;  %vm760_vm3 = vcmask 1022976  }
  0x3e   : > { %355 = vrot.lane.b32.xlu1 %v323_v3, %s2028_s2  ;;  %v313_v9 = vpack.c.bf16 %v308_v6, %v305_v5  ;;  %v301_v11 = vld [vmem:[%s2189_s12 + $0x18] sm:$0xff]  ;;  %v302_v12 = vld [vmem:[%s2189_s12 + $0x20] sm:$0xff]  ;;  %v300_v15 = vld [vmem:[%s2189_s12 + $0x10] sm:$0xff]  ;;  %vm915_vm4 = vcmask 1014784   ;;  %s2755_s10 = sld [smem:[#allocation25_spill]]  ;;  %s1382_s14 = scalar_lea.sflag [#allocation4], %s2185_s1 }
  0x3f   : > { %351 = vrot.lane.b32.xlu0 %v312_v7, %s2028_s2  ;;  %v311_v13 = vpack.c.bf16 %v302_v12, %v299_v8  ;;  %433 = vmatpush.bf16.msra.mxu2 %v312_v7  ;;  %v310_v14 = vpack.c.bf16 %v301_v11, %v298_v10  ;;  %v303_v16 = vld [vmem:[%s2189_s12 + $0x28] sm:$0xff]  ;;  %v1645_v18 = vld [vmem:[#allocation5] sm:$0xff]  ;;  %v1647_v20 = vld [vmem:[#allocation7] sm:$0xff]  ;;  %v2032_v8 = vmov 0  }
  0x40   : > { %452 = vmatpush.bf16.msra.mxu3 %v313_v9  ;;  %v322_v17 = vpack.c.bf16 %v303_v16, %v300_v15  ;;  %v1646_v19 = vld [vmem:[#allocation5 + $0x8] sm:$0xff]  ;;  %v1648_v21 = vld [vmem:[#allocation7 + $0x8] sm:$0xff]  ;;  %v1649_v33 = vld [vmem:[#allocation5 + $0x10] sm:$0xff]  ;;  %1781 = vset.pattern.permute.xlu0 %v2032_v8 }
  0x41   : > { %347 = vrot.lane.b32.xlu2 %v311_v13, %s2028_s2  ;;  %v1655_v42 = vld [vmem:[#allocation7 + $0x20] sm:$0xff]  ;;  %v1650_v45 = vld [vmem:[#allocation5 + $0x18] sm:$0xff]  ;;  %v1651_v56 = vld [vmem:[#allocation7 + $0x10] sm:$0xff]  ;;  %1782 = vset.pattern.permute.xlu1 %v2032_v8 }
  0x42   : > { %v1656_v52 = vld [vmem:[#allocation7 + $0x28] sm:$0xff]  ;;  %v1659_v0 = vld [vmem:[#allocation7 + $0x30] sm:$0xff]  ;;  %v1652_v4 = vld [vmem:[#allocation7 + $0x18] sm:$0xff]  ;;  %1783 = vset.pattern.permute.xlu2 %v2032_v8 }
  0x43   : > { %434 = vmatpush.bf16.msra.mxu2 %v310_v14  ;;  %v1660_v5 = vld [vmem:[#allocation7 + $0x38] sm:$0xff]  ;;  %v1653_v6 = vld [vmem:[#allocation5 + $0x20] sm:$0xff]  ;;  %v1663_v12 = vld [vmem:[#allocation7 + $0x40] sm:$0xff] }
  0x44   : > { %453 = vmatpush.bf16.msra.mxu3 %v311_v13  ;;  %v1076_v11 = vld [vmem:[%s2700_s4 + $0x8] sm:$0xff]  ;;  %s1938_s27 = scalar_lea.hbm %s2755_s10, 256 }
  0x45   : > { %v1654_v15 = vld [vmem:[#allocation5 + $0x28] sm:$0xff] }
  0x46   : > { %345 = vrot.lane.b32.xlu1 %v310_v14, %s2028_s2  ;;  %1539 = vmatmul.msk.bf16.vlgmr.msra.gmra.mxu2 %vm366_vm0, %v1645_v18  ;;  %v1044_v16 = vld [vmem:[%s2699_s3 + $0x8] sm:$0xff] }
  0x47   : > { %546 = vmatpush.bf16.msrb.mxu2 %v312_v7  ;;  %353 = vrot.lane.b32.xlu0 %v313_v9, %s2028_s2 }
  0x48   : > { %565 = vmatpush.bf16.msrb.mxu3 %v313_v9 }
  0x49   : > { %349 = vrot.lane.b32.xlu2 %v322_v17, %s2028_s2  ;;  %1541 = vmatmul.msk.bf16.vlgmr.msra.gmra.mxu3 %vm366_vm0, %v1645_v18  ;;  %s2033_s2 = smov 2  }
  0x4b   : > { %547 = vmatpush.bf16.msrb.mxu2 %v310_v14 }
  0x4c   : > { %566 = vmatpush.bf16.msrb.mxu3 %v311_v13 }
  0x4e   : > { %601 = vrot.lane.b32.xlu1 %v313_v9, %s2029_s5 }
  0x4f   : > { %599 = vrot.lane.b32.xlu0 %v312_v7, %s2029_s5 }
  0x51   : > { %603 = vrot.lane.b32.xlu2 %v323_v3, %s2029_s5 }
  0x56   : > { %595 = vrot.lane.b32.xlu1 %v311_v13, %s2029_s5  ;;  %1540 = vmatmul.msk.bf16.gmra.mxu2 %vm366_vm0, %v1646_v19 }
  0x57   : > { %593 = vrot.lane.b32.xlu0 %v310_v14, %s2029_s5 }
  0x59   : > { %597 = vrot.lane.b32.xlu2 %v322_v17, %s2029_s5  ;;  %1542 = vmatmul.msk.bf16.gmra.mxu3 %vm366_vm0, %v1646_v19 }
  0x5e   : > { %756 = vrot.lane.b32.xlu1 %v313_v9, %s2030_s18 }
  0x5f   : > { %754 = vrot.lane.b32.xlu0 %v312_v7, %s2030_s18 }
  0x61   : > { %758 = vrot.lane.b32.xlu2 %v323_v3, %s2030_s18 }
  0x66   : > { %750 = vrot.lane.b32.xlu1 %v311_v13, %s2030_s18  ;;  %1563 = vmatmul.msk.bf16.vlgmr.msrb.gmra.mxu2 %vm366_vm0, %v1647_v20 }
  0x67   : > { %748 = vrot.lane.b32.xlu0 %v310_v14, %s2030_s18 }
  0x69   : > { %752 = vrot.lane.b32.xlu2 %v322_v17, %s2030_s18  ;;  %1565 = vmatmul.msk.bf16.vlgmr.msrb.gmra.mxu3 %vm366_vm0, %v1647_v20  ;;  %v1045_v20 = vld [vmem:[%s2699_s3 + $0x10] sm:$0xff]  ;;  %s1518_s18 = sshll.u32 %s2185_s1, 6 }
  0x6e   : > { %911 = vrot.lane.b32.xlu1 %v313_v9, %s2031_s23 }
  0x6f   : > { %909 = vrot.lane.b32.xlu0 %v312_v7, %s2031_s23  ;;  %v1075_v7 = vld [vmem:[%s2700_s4] sm:$0xff] }
  0x71   : > { %913 = vrot.lane.b32.xlu2 %v323_v3, %s2031_s23 }
  0x76   : > { %905 = vrot.lane.b32.xlu1 %v311_v13, %s2031_s23  ;;  %1564 = vmatmul.msk.bf16.gmra.mxu2 %vm366_vm0, %v1648_v21 }
  0x77   : > { %903 = vrot.lane.b32.xlu0 %v310_v14, %s2031_s23 }
  0x79   : > { %907 = vrot.lane.b32.xlu2 %v322_v17, %s2031_s23  ;;  %1566 = vmatmul.msk.bf16.gmra.mxu3 %vm366_vm0, %v1648_v21  ;;  %v1078_v17 = vld [vmem:[%s2700_s4 + $0x18] sm:$0xff]  ;;  %s2632_s23 = scalar_lea.vmem [#allocation8], %s1518_s18 }
  0x7a   : > { %v1664_v21 = vld [vmem:[#allocation7 + $0x48] sm:$0xff] }
  0x7e   : > { %1086 = vperm.xlu1 %1782, %v1076_v11  }
  0x7f   : > { %1081 = vperm.xlu0 %1781, %v1075_v7  }
  0x86   : > { %1096 = vperm.xlu1 %1782, %v1078_v17  }
  0x87   : > { %1054 = vperm.xlu0 %1781, %v1044_v16  }
  0x8e   : > { %1059 = vperm.xlu1 %1782, %v1045_v20  }
  0x9b   : > { %v348_v22 = vpop.permute.xlu2 %347 }
  0xa3   : > { %v350_v25 = vpop.permute.xlu2 %349 }
  0xa4   : > { %v359_v32 = vsel %vm357_vm1, %v348_v22, %v350_v25 }
  0xab   : > { %v604_v30 = vpop.permute.xlu2 %603 }
  0xb0   : > { %v356_v23 = vpop.permute.xlu1 %355 }
  0xb1   : > { %v352_v24 = vpop.permute.xlu0 %351 }
  0xb3   : > { %v598_v38 = vpop.permute.xlu2 %597 }
  0xb8   : > { %v346_v26 = vpop.permute.xlu1 %345 }
  0xb9   : > { %v354_v27 = vpop.permute.xlu0 %353  ;;  %v358_v31 = vsel %vm357_vm1, %v346_v26, %v348_v22  ;;  %v1657_v22 = vld [vmem:[#allocation5 + $0x30] sm:$0xff] }
  0xba   : > { %v360_v28 = vsel %vm357_vm1, %v352_v24, %v354_v27  ;;  %v361_v29 = vsel %vm357_vm1, %v354_v27, %v356_v23  ;;  %v1077_v27 = vld [vmem:[%s2700_s4 + $0x10] sm:$0xff] }
  0xbb   : > { %379 = vmatpush.bf16.msra.mxu0 %v360_v28  ;;  %398 = vmatpush.bf16.msra.mxu1 %v361_v29  ;;  %v759_v44 = vpop.permute.xlu2 %758 }
  0xbc   : > { %1091 = vperm.xlu2 %1783, %v1077_v27  }
  0xbf   : > { %380 = vmatpush.bf16.msra.mxu0 %v358_v31  ;;  %399 = vmatpush.bf16.msra.mxu1 %v359_v32 }
  0xc0   : > { %v602_v34 = vpop.permute.xlu1 %601 }
  0xc1   : > { %v600_v35 = vpop.permute.xlu0 %599  ;;  %v609_v36 = vsel %vm605_vm2, %v602_v34, %v604_v30 }
  0xc2   : > { %v608_v37 = vsel %vm605_vm2, %v600_v35, %v602_v34  ;;  %1527 = vmatmul.msk.bf16.vlgmr.msra.gmra.mxu0 %vm366_vm0, %v1649_v33  ;;  %1529 = vmatmul.msk.bf16.vlgmr.msra.gmra.mxu1 %vm366_vm0, %v1649_v33  ;;  %v1661_v35 = vld [vmem:[#allocation5 + $0x40] sm:$0xff] }
  0xc3   : > { %492 = vmatpush.bf16.msrb.mxu0 %v360_v28  ;;  %511 = vmatpush.bf16.msrb.mxu1 %v361_v29  ;;  %v753_v50 = vpop.permute.xlu2 %752  ;;  %v1658_v28 = vld [vmem:[#allocation5 + $0x38] sm:$0xff]  ;;  %v1043_v29 = vld [vmem:[%s2699_s3] sm:$0xff] }
  0xc4   : > { %693 = vmatpush.bf16.msra.mxu2 %v608_v37  ;;  %712 = vmatpush.bf16.msra.mxu3 %v609_v36 }
  0xc5   : > { %1049 = vperm.xlu2 %1783, %v1043_v29  }
  0xc7   : > { %493 = vmatpush.bf16.msrb.mxu0 %v358_v31  ;;  %512 = vmatpush.bf16.msrb.mxu1 %v359_v32  ;;  %v1046_v32 = vld [vmem:[%s2699_s3 + $0x18] sm:$0xff] }
  0xc8   : > { %v596_v39 = vpop.permute.xlu1 %595 }
  0xc9   : > { %v594_v40 = vpop.permute.xlu0 %593  ;;  %v607_v41 = vsel %vm605_vm2, %v596_v39, %v598_v38  ;;  %v2252_v9 = vpop.f32.mrf.mxu2 }
  0xca   : > { %v606_v43 = vsel %vm605_vm2, %v594_v40, %v596_v39  ;;  %713 = vmatpush.bf16.msra.mxu3 %v607_v41 }
  0xcb   : > { %626 = vmatpush.bf16.msra.mxu0 %v608_v37  ;;  %645 = vmatpush.bf16.msra.mxu1 %v609_v36  ;;  %v914_v57 = vpop.permute.xlu2 %913 }
  0xcc   : > { %694 = vmatpush.bf16.msra.mxu2 %v606_v43  ;;  %v2254_v10 = vpop.f32.mrf.mxu3 }
  0xcd   : > { %1589 = vmatmul.msk.bf16.vlgmr.msra.gmra.mxu3 %vm366_vm0, %v1655_v42  ;;  %1064 = vperm.xlu2 %1783, %v1046_v32  }
  0xcf   : > { %646 = vmatpush.bf16.msra.mxu1 %v607_v41  ;;  %627 = vmatpush.bf16.msra.mxu0 %v606_v43 }
  0xd0   : > { %1587 = vmatmul.msk.bf16.vlgmr.msra.gmra.mxu2 %vm366_vm0, %v1655_v42  ;;  %v757_v46 = vpop.permute.xlu1 %756  ;;  %v1662_v42 = vld [vmem:[#allocation5 + $0x48] sm:$0xff] }
  0xd1   : > { %v755_v47 = vpop.permute.xlu0 %754  ;;  %v764_v48 = vsel %vm760_vm3, %v757_v46, %v759_v44  ;;  %v2261_v13 = vpop.f32.mrf.mxu2 }
  0xd2   : > { %1528 = vmatmul.msk.bf16.gmra.mxu0 %vm366_vm0, %v1650_v45  ;;  %1530 = vmatmul.msk.bf16.gmra.mxu1 %vm366_vm0, %v1650_v45  ;;  %v763_v49 = vsel %vm760_vm3, %v755_v47, %v757_v46 }
  0xd3   : > { %848 = vmatpush.bf16.msrb.mxu2 %v763_v49  ;;  %867 = vmatpush.bf16.msrb.mxu3 %v764_v48  ;;  %v908_v62 = vpop.permute.xlu2 %907 }
  0xd4   : > { %v2263_v14 = vpop.f32.mrf.mxu3 }
  0xd8   : > { %v751_v51 = vpop.permute.xlu1 %750 }
  0xd9   : > { %v749_v53 = vpop.permute.xlu0 %748  ;;  %v762_v54 = vsel %vm760_vm3, %v751_v51, %v753_v50  ;;  %v2277_v19 = vpop.f32.mrf.mxu2 }
  0xda   : > { %v761_v55 = vsel %vm760_vm3, %v749_v53, %v751_v51  ;;  %868 = vmatpush.bf16.msrb.mxu3 %v762_v54 }
  0xdb   : > { %849 = vmatpush.bf16.msrb.mxu2 %v761_v55 }
  0xdc   : > { %v2275_v18 = vpop.f32.mrf.mxu3 }
  0xdd   : > { %1590 = vmatmul.msk.bf16.gmra.mxu3 %vm366_vm0, %v1656_v52 }
  0xe0   : > { %1588 = vmatmul.msk.bf16.gmra.mxu2 %vm366_vm0, %v1656_v52  ;;  %v912_v58 = vpop.permute.xlu1 %911 }
  0xe1   : > { %v910_v59 = vpop.permute.xlu0 %909  ;;  %v919_v60 = vsel %vm915_vm4, %v912_v58, %v914_v57  ;;  %v2286_v24 = vpop.f32.mrf.mxu2 }
  0xe2   : > { %1551 = vmatmul.msk.bf16.vlgmr.msrb.gmra.mxu0 %vm366_vm0, %v1651_v56  ;;  %1553 = vmatmul.msk.bf16.vlgmr.msrb.gmra.mxu1 %vm366_vm0, %v1651_v56  ;;  %v918_v61 = vsel %vm915_vm4, %v910_v59, %v912_v58  ;;  %2732 = vst [vmem:[#allocation20_spill] sm:$0xff] %v2286_v24 }
  0xe3   : > { %781 = vmatpush.bf16.msrb.mxu0 %v763_v49  ;;  %800 = vmatpush.bf16.msrb.mxu1 %v764_v48 }
  0xe4   : > { %1003 = vmatpush.bf16.msra.mxu2 %v918_v61  ;;  %1022 = vmatpush.bf16.msra.mxu3 %v919_v60  ;;  %v2284_v23 = vpop.f32.mrf.mxu3 }
  0xe5   : > { %2731 = vst [vmem:[#allocation19_spill] sm:$0xff] %v2284_v23 }
  0xe7   : > { %782 = vmatpush.bf16.msrb.mxu0 %v761_v55  ;;  %801 = vmatpush.bf16.msrb.mxu1 %v762_v54 }
  0xe8   : > { %v906_v63 = vpop.permute.xlu1 %905 }
  0xe9   : > { %v904_v1 = vpop.permute.xlu0 %903  ;;  %v917_v2 = vsel %vm915_vm4, %v906_v63, %v908_v62  ;;  %v549_v25 = vpop.f32.mrf.mxu2 }
  0xea   : > { %v916_v3 = vsel %vm915_vm4, %v904_v1, %v906_v63  ;;  %1023 = vmatpush.bf16.msra.mxu3 %v917_v2 }
  0xeb   : > { %1004 = vmatpush.bf16.msra.mxu2 %v916_v3 }
  0xec   : > { %v568_v26 = vpop.f32.mrf.mxu3 }
  0xed   : > { %1613 = vmatmul.msk.bf16.vlgmr.msrb.gmra.mxu3 %vm366_vm0, %v1659_v0 }
  0xf0   : > { %1611 = vmatmul.msk.bf16.vlgmr.msrb.gmra.mxu2 %vm366_vm0, %v1659_v0 }
  0xf1   : > { %v2298_v30 = vpop.f32.mrf.mxu2  ;;  %v1082_v32 = vpop.permute.xlu0 %1081 }
  0xf2   : > { %1552 = vmatmul.msk.bf16.gmra.mxu0 %vm366_vm0, %v1652_v4  ;;  %1554 = vmatmul.msk.bf16.gmra.mxu1 %vm366_vm0, %v1652_v4 }
  0xf4   : > { %v570_v31 = vpop.f32.mrf.mxu3 }
  0xf9   : > { %v2303_v33 = vpop.f32.mrf.mxu2 }
  0xfc   : > { %v2305_v34 = vpop.f32.mrf.mxu3 }
  0xfd   : > { %1614 = vmatmul.msk.bf16.gmra.mxu3 %vm366_vm0, %v1660_v5 }
 0x100   : > { %1612 = vmatmul.msk.bf16.gmra.mxu2 %vm366_vm0, %v1660_v5 }
 0x101   : > { %v2313_v38 = vpop.f32.mrf.mxu2 }
 0x102   : > { %1575 = vmatmul.msk.bf16.vlgmr.msra.gmra.mxu0 %vm366_vm0, %v1653_v6  ;;  %1577 = vmatmul.msk.bf16.vlgmr.msra.gmra.mxu1 %vm366_vm0, %v1653_v6 }
 0x103   : > { %936 = vmatpush.bf16.msra.mxu0 %v918_v61  ;;  %955 = vmatpush.bf16.msra.mxu1 %v919_v60 }
 0x104   : > { %v2315_v39 = vpop.f32.mrf.mxu3 }
 0x107   : > { %937 = vmatpush.bf16.msra.mxu0 %v916_v3  ;;  %956 = vmatpush.bf16.msra.mxu1 %v917_v2 }
 0x10d   : > { %1637 = vmatmul.msk.bf16.vlgmr.msra.gmra.mxu3 %vm366_vm0, %v1663_v12 }
 0x110   : > { %1635 = vmatmul.msk.bf16.vlgmr.msra.gmra.mxu2 %vm366_vm0, %v1663_v12 }
 0x112   : > { %1576 = vmatmul.msk.bf16.gmra.mxu0 %vm366_vm0, %v1654_v15  ;;  %1578 = vmatmul.msk.bf16.gmra.mxu1 %vm366_vm0, %v1654_v15 }
 0x11d   : > { %1638 = vmatmul.msk.bf16.gmra.mxu3 %vm366_vm0, %v1664_v21 }
 0x120   : > { %1636 = vmatmul.msk.bf16.gmra.mxu2 %vm366_vm0, %v1664_v21 }
 0x122   : > { %1599 = vmatmul.msk.bf16.vlgmr.msrb.gmra.mxu0 %vm366_vm0, %v1657_v22  ;;  %1601 = vmatmul.msk.bf16.vlgmr.msrb.gmra.mxu1 %vm366_vm0, %v1657_v22 }
 0x132   : > { %1600 = vmatmul.msk.bf16.gmra.mxu0 %vm366_vm0, %v1658_v28  ;;  %1602 = vmatmul.msk.bf16.gmra.mxu1 %vm366_vm0, %v1658_v28 }
 0x13f   : > { %v2307_v36 = vpop.f32.mrf.mxu0  ;;  %v2309_v37 = vpop.f32.mrf.mxu1 }
 0x142   : > { %1623 = vmatmul.msk.bf16.vlgmr.msra.gmra.mxu0 %vm366_vm0, %v1661_v35  ;;  %1625 = vmatmul.msk.bf16.vlgmr.msra.gmra.mxu1 %vm366_vm0, %v1661_v35 }
 0x147   : > { %v2317_v40 = vpop.f32.mrf.mxu0  ;;  %v2319_v41 = vpop.f32.mrf.mxu1 }
 0x14f   : > { %v2321_v43 = vpop.f32.mrf.mxu0  ;;  %v2323_v44 = vpop.f32.mrf.mxu1 }
 0x150   : > { %v715_v45 = vpop.f32.mrf.mxu3 }
 0x152   : > { %1624 = vmatmul.msk.bf16.gmra.mxu0 %vm366_vm0, %v1662_v42  ;;  %1626 = vmatmul.msk.bf16.gmra.mxu1 %vm366_vm0, %v1662_v42 }
 0x153   : > { %v696_v46 = vpop.f32.mrf.mxu2 }
 0x157   : > { %v2327_v47 = vpop.f32.mrf.mxu0  ;;  %v2329_v48 = vpop.f32.mrf.mxu1 }
 0x158   : > { %2733 = vst [vmem:[#allocation21_spill] sm:$0xff] %v2327_v47  ;;  %v717_v49 = vpop.f32.mrf.mxu3 }
 0x159   : > { %2734 = vst [vmem:[#allocation22_spill] sm:$0xff] %v2329_v48 }
 0x15b   : > { %v698_v50 = vpop.f32.mrf.mxu2 }
 0x15f   : > { %v495_v51 = vpop.f32.mrf.mxu0  ;;  %v514_v52 = vpop.f32.mrf.mxu1 }
 0x160   : > { %v720_v53 = vpop.f32.mrf.mxu3  ;;  %v569_v12 = vadd.f32 %v568_v26, %v514_v52  ;;  %v550_v16 = vadd.f32 %v549_v25, %v495_v51 }
 0x162   : > { %v726_v17 = vadd.f32 %v715_v45, %v569_v12  ;;  %v725_v20 = vadd.f32 %v696_v46, %v550_v16 }
 0x163   : > { %v701_v54 = vpop.f32.mrf.mxu2 }
 0x167   : > { %v497_v55 = vpop.f32.mrf.mxu0  ;;  %v516_v56 = vpop.f32.mrf.mxu1 }
 0x168   : > { %v2331_v57 = vpop.f32.mrf.mxu3  ;;  %v571_v35 = vadd.f32 %v570_v31, %v516_v56  ;;  %v552_v48 = vadd.f32 %v2298_v30, %v497_v55  ;;  %v1087_v56 = vpop.permute.xlu1 %1086 }
 0x16a   : > { %v728_v47 = vadd.f32 %v717_v49, %v571_v35  ;;  %v727_v45 = vadd.f32 %v698_v50, %v552_v48 }
 0x16b   : > { %v2333_v58 = vpop.f32.mrf.mxu2 }
 0x16f   : > { %v500_v59 = vpop.f32.mrf.mxu0  ;;  %v519_v60 = vpop.f32.mrf.mxu1 }
 0x170   : > { %v870_v61 = vpop.f32.mrf.mxu3 }
 0x171   : > { %v881_v21 = vadd.f32 %v870_v61, %v726_v17 }
 0x173   : > { %v851_v62 = vpop.f32.mrf.mxu2 }
 0x174   : > { %v880_v28 = vadd.f32 %v851_v62, %v725_v20  ;;  %v574_v20 = vadd.f32 %v2305_v34, %v519_v60 }
 0x176   : > { %v730_v50 = vadd.f32 %v720_v53, %v574_v20 }
 0x177   : > { %v2335_v63 = vpop.f32.mrf.mxu0  ;;  %v2337_v0 = vpop.f32.mrf.mxu1 }
 0x178   : > { %v872_v1 = vpop.f32.mrf.mxu3  ;;  %v576_v53 = vadd.f32 %v2315_v39, %v2337_v0 }
 0x179   : > { %v883_v51 = vadd.f32 %v872_v1, %v728_v47 }
 0x17b   : > { %v853_v2 = vpop.f32.mrf.mxu2 }
 0x17c   : > { %v882_v62 = vadd.f32 %v853_v2, %v727_v45 }
 0x17f   : > { %v2339_v3 = vpop.f32.mrf.mxu0  ;;  %v2341_v4 = vpop.f32.mrf.mxu1 }
 0x180   : > { %v875_v5 = vpop.f32.mrf.mxu3 }
 0x181   : > { %v885_v2 = vadd.f32 %v875_v5, %v730_v50 }
 0x183   : > { %v856_v6 = vpop.f32.mrf.mxu2 }
 0x187   : > { %v2343_v7 = vpop.f32.mrf.mxu0  ;;  %v2345_v8 = vpop.f32.mrf.mxu1 }
 0x188   : > { %v2347_v11 = vpop.f32.mrf.mxu3 }
 0x18b   : > { %v2349_v15 = vpop.f32.mrf.mxu2 }
 0x18f   : > { %v2351_v22 = vpop.f32.mrf.mxu0  ;;  %v2353_v27 = vpop.f32.mrf.mxu1 }
 0x190   : > { %v1025_v29 = vpop.f32.mrf.mxu3 }
 0x191   : > { %v1036_v23 = vadd.f32 %v1025_v29, %v881_v21 }
 0x193   : > { %v1006_v42 = vpop.f32.mrf.mxu2  ;;  %v1100_v26 = vadd.f32 %v1082_v32, %v1036_v23 }
 0x194   : > { %v1035_v24 = vadd.f32 %v1006_v42, %v880_v28 }
 0x195   : > { %v1108_v25 = vsub.f32 0.0, %v1100_v26  ;;  %v1092_v26 = vpop.permute.xlu2 %1091 }
 0x196   : > { %v1099_v52 = vadd.f32 %v1082_v32, %v1035_v24  ;;  %v555_v24 = vadd.f32 %v2303_v33, %v500_v59 }
 0x197   : > { %v1117_v61 = vmul.f32 1.442695, %v1108_v25  ;;  %v2356_v12 = vpop.f32.mrf.mxu0  ;;  %v2358_v16 = vpop.f32.mrf.mxu1  ;;  %v557_v25 = vadd.f32 %v2313_v38, %v2335_v63 }
 0x198   : > { %v1107_v46 = vsub.f32 0.0, %v1099_v52  ;;  %v1027_v31 = vpop.f32.mrf.mxu3  ;;  %v729_v1 = vadd.f32 %v701_v54, %v555_v24 }
 0x199   : > { %1784 = vpow2.f32 %v1117_v61  ;;  %v1038_v23 = vadd.f32 %v1027_v31, %v883_v51  ;;  %v732_v51 = vadd.f32 %v2331_v57, %v576_v53  ;;  %v731_v39 = vadd.f32 %v2333_v58, %v557_v25 }
 0x19a   : > { %v1115_v17 = vmul.f32 1.442695, %v1107_v46  ;;  %v884_v60 = vadd.f32 %v856_v6, %v729_v1 }
 0x19b   : > { %v1008_v30 = vpop.f32.mrf.mxu2  ;;  %v1102_v49 = vadd.f32 %v1087_v56, %v1038_v23  ;;  %v886_v63 = vadd.f32 %v2349_v15, %v731_v39 }
 0x19c   : > { %1786 = vpow2.f32 %v1115_v17  ;;  %v1037_v48 = vadd.f32 %v1008_v30, %v882_v62  ;;  %v887_v17 = vadd.f32 %v2347_v11, %v732_v51 }
 0x19d   : > { %v1110_v55 = vsub.f32 0.0, %v1102_v49  ;;  %v1097_v49 = vpop.permute.xlu1 %1096 }
 0x19e   : > { %v1101_v47 = vadd.f32 %v1087_v56, %v1037_v48 }
 0x19f   : > { %v1785_v28 = vpop.eup %1784  ;;  %v1121_v29 = vmul.f32 1.442695, %v1110_v55  ;;  %v2362_v32 = vpop.f32.mrf.mxu0 }
 0x1a0   : > { %v1109_v21 = vsub.f32 0.0, %v1101_v47  ;;  %v2364_v35 = vpop.f32.mrf.mxu1  ;;  %v2366_v42 = vadd.f32 1.0, %v1785_v28  ;;  %v1030_v59 = vpop.f32.mrf.mxu3 }
 0x1a1   : > { %1788 = vpow2.f32 %v1121_v29  ;;  %v1040_v5 = vadd.f32 %v1030_v59, %v885_v2 }
 0x1a2   : > { %v1787_v34 = vpop.eup %1786  ;;  %v1119_v33 = vmul.f32 1.442695, %v1109_v21  ;;  %1790 = vrcp.f32 %v2366_v42  ;;  %vm1159_vm7 = vweird.f32 %v2366_v42 }
 0x1a3   : > { %v2370_v52 = vadd.f32 1.0, %v1787_v34  ;;  %v1011_v54 = vpop.f32.mrf.mxu2  ;;  %v1104_v6 = vadd.f32 %v1092_v26, %v1040_v5 }
 0x1a4   : > { %v1039_v45 = vadd.f32 %v1011_v54, %v884_v60  ;;  %1792 = vpow2.f32 %v1119_v33 }
 0x1a5   : > { %1794 = vrcp.f32 %v2370_v52  ;;  %v1112_v61 = vsub.f32 0.0, %v1104_v6  ;;  %vm1144_vm9 = vweird.f32 %v2370_v52 }
 0x1a6   : > { %v1103_v46 = vadd.f32 %v1092_v26, %v1039_v45 }
 0x1a7   : > { %v1789_v62 = vpop.eup %1788  ;;  %v1125_v31 = vmul.f32 1.442695, %v1112_v61  ;;  %v2379_v56 = vpop.f32.mrf.mxu0 }
 0x1a8   : > { %v1111_v0 = vsub.f32 0.0, %v1103_v46  ;;  %v2381_v38 = vpop.f32.mrf.mxu1  ;;  %v1032_v30 = vpop.f32.mrf.mxu3  ;;  %v2386_v57 = vadd.f32 1.0, %v1789_v62  ;;  %v437_v46 = vadd.f32 %v2252_v9, %v2307_v36  ;;  %v456_v62 = vadd.f32 %v2254_v10, %v2309_v37 }
 0x1a9   : > { %v2384_v23 = vpop.eup %1790  ;;  %1796 = vpow2.f32 %v1125_v31  ;;  %v1042_v58 = vadd.f32 %v1032_v30, %v887_v17  ;;  %v439_v17 = vadd.f32 %v2261_v13, %v2317_v40  ;;  %v2434_v30 = vadd.f32 %v2275_v18, %v2323_v44 }
 0x1aa   : > { %v1123_v20 = vmul.f32 1.442695, %v1111_v0  ;;  %v1793_v48 = vpop.eup %1792  ;;  %v1155_v28 = vmul.f32 %v2384_v23, %v2366_v42  ;;  %v658_v10 = vadd.f32 %v2339_v3, %v437_v46  ;;  %v659_v37 = vadd.f32 %v2341_v4, %v456_v62 }
 0x1ab   : > { %v1013_v24 = vpop.f32.mrf.mxu2  ;;  %v2388_v11 = vpop.eup %1794  ;;  %v2390_v50 = vadd.f32 1.0, %v1793_v48  ;;  %v1106_v55 = vadd.f32 %v1097_v49, %v1042_v58  ;;  %vm1160_vm5 = vweird.f32 %v2384_v23  ;;  %v1165_v40 = vand.u32 2147483648, %v2366_v42 }
 0x1ac   : > { %v1041_v47 = vadd.f32 %v1013_v24, %v886_v63  ;;  %1798 = vpow2.f32 %v1123_v20  ;;  %v1140_v2 = vmul.f32 %v2388_v11, %v2370_v52  ;;  %v1156_v5 = vsub.f32 1.0, %v1155_v28  ;;  %vm2454_vm8 = vmor %vm1159_vm7, %vm1160_vm5 }
 0x1ad   : > { %1800 = vrcp.f32 %v2386_v57  ;;  %v1114_v15 = vsub.f32 0.0, %v1106_v55  ;;  %v458_v63 = vadd.f32 %v2263_v14, %v2319_v41  ;;  %v442_v20 = vadd.f32 %v2277_v19, %v2321_v43 }
 0x1ae   : > { %v1105_v1 = vadd.f32 %v1097_v49, %v1041_v47  ;;  %1802 = vrcp.f32 %v2390_v50  ;;  %v1141_v25 = vsub.f32 1.0, %v1140_v2  ;;  %v1157_v51 = vmul.f32 %v2384_v23, %v1156_v5 }
 0x1af   : > { %v1797_v29 = vpop.eup %1796  ;;  %v1129_v34 = vmul.f32 1.442695, %v1114_v15  ;;  %v2398_v60 = vpop.f32.mrf.mxu0  ;;  %vm1145_vm6 = vweird.f32 %v2388_v11  ;;  %v660_v43 = vadd.f32 %v2343_v7, %v439_v17  ;;  %v661_v58 = vadd.f32 %v2345_v8, %v458_v63 }
 0x1b0   : > { %v1113_v21 = vsub.f32 0.0, %v1105_v1  ;;  %v2400_v33 = vpop.f32.mrf.mxu1  ;;  %v2402_v53 = vadd.f32 1.0, %v1797_v29  ;;  %v1142_v61 = vmul.f32 %v2388_v11, %v1141_v25  ;;  %v1158_v14 = vadd.f32 %v2384_v23, %v1157_v51  ;;  %vm2465_vm10 = vmor %vm1144_vm9, %vm1145_vm6 }
 0x1b1   : > { %1804 = vpow2.f32 %v1129_v34  ;;  %v1163_v49 = vand.u32 2147483647, %v2366_v42  ;;  %v1150_v47 = vand.u32 2147483648, %v2370_v52  ;;  %v813_v7 = vadd.f32 %v2362_v32, %v658_v10 }
 0x1b2   : > { %v1127_v59 = vmul.f32 1.442695, %v1113_v21  ;;  %v1799_v26 = vpop.eup %1798  ;;  %v1143_v19 = vadd.f32 %v2388_v11, %v1142_v61  ;;  %v814_v55 = vadd.f32 %v2364_v35, %v659_v37  ;;  %v1166_v1 = vor.u32 1.1754944e-38, %v1165_v40 }
 0x1b3   : > { %v2404_v54 = vadd.f32 1.0, %v1799_v26  ;;  %v2406_v45 = vpop.eup %1800  ;;  %v1148_v8 = vand.u32 2147483647, %v2370_v52  ;;  %v1162_v42 = vsel %vm2454_vm8, %v2384_v23, %v1158_v14  ;;  %vm1164_vm11 = vcmp.eq.f32.partialorder %v1163_v49, 8.507059e+37  ;;  %v1050_v26 = vpop.permute.xlu2 %1049 }
 0x1b4   : > { %1806 = vpow2.f32 %v1127_v59  ;;  %v2408_v6 = vpop.eup %1802  ;;  %v1185_v39 = vmul.f32 %v2406_v45, %v2386_v57  ;;  %v1147_v32 = vsel %vm2465_vm10, %v2388_v11, %v1143_v19  ;;  %v1151_v59 = vor.u32 1.1754944e-38, %v1150_v47  ;;  %v1060_v14 = vpop.permute.xlu1 %1059 }
 0x1b5   : > { %1808 = vrcp.f32 %v2402_v53  ;;  %v1170_v36 = vmul.f32 %v2408_v6, %v2390_v50  ;;  %v1167_v11 = vsel %vm1164_vm11, %v1166_v1, %v1162_v42  ;;  %vm1149_vm12 = vcmp.eq.f32.partialorder %v1148_v8, 8.507059e+37 }
 0x1b6   : > { %1810 = vrcp.f32 %v2404_v54  ;;  %v1186_v41 = vsub.f32 1.0, %v1185_v39  ;;  %vm1190_vm13 = vweird.f32 %v2406_v45  ;;  %v1193_v5 = vand.u32 2147483647, %v2386_v57 }
 0x1b7   : > { %v1805_v0 = vpop.eup %1804  ;;  %v2422_v31 = vpop.f32.mrf.mxu0  ;;  %v1171_v3 = vsub.f32 1.0, %v1170_v36  ;;  %v1152_v51 = vsel %vm1149_vm12, %v1151_v59, %v1147_v32  ;;  %vm1175_vm14 = vweird.f32 %v2408_v6  ;;  %v662_v36 = vadd.f32 %v2351_v22, %v442_v20 }
 0x1b8   : > { %v2424_v9 = vpop.f32.mrf.mxu1  ;;  %v2441_v24 = vadd.f32 1.0, %v1805_v0  ;;  %v1187_v35 = vmul.f32 %v2406_v45, %v1186_v41  ;;  %vm1189_vm15 = vweird.f32 %v2386_v57  ;;  %vm1174_vm0 = vweird.f32 %v2390_v50 }
 0x1b9   : > { %v1172_v2 = vmul.f32 %v2408_v6, %v1171_v3  ;;  %v1178_v37 = vand.u32 2147483647, %v2390_v50  ;;  %v1180_v40 = vand.u32 2147483648, %v2390_v50  ;;  %vm2500_vm1 = vmor %vm1189_vm15, %vm1190_vm13  ;;  %v1195_v22 = vand.u32 2147483648, %v2386_v57 }
 0x1ba   : > { %v1807_v13 = vpop.eup %1806  ;;  %1812 = vrcp.f32 %v2441_v24  ;;  %v1188_v39 = vadd.f32 %v2406_v45, %v1187_v35  ;;  %v663_v20 = vadd.f32 %v2353_v27, %v2434_v30  ;;  %v815_v19 = vadd.f32 %v2379_v56, %v660_v43  ;;  %vm2513_vm3 = vmor %vm1174_vm0, %vm1175_vm14 }
 0x1bb   : > { %v2445_v18 = vpop.eup %1808  ;;  %v2448_v44 = vadd.f32 1.0, %v1807_v13  ;;  %v1173_v61 = vadd.f32 %v2408_v6, %v1172_v2  ;;  %v816_v41 = vadd.f32 %v2381_v38, %v661_v58  ;;  %vm2517_vm4 = vcmp.eq.f32.partialorder %v1193_v5, 8.507059e+37 }
 0x1bc   : > { %v2451_v4 = vpop.eup %1810  ;;  %v1215_v29 = vmul.f32 %v2445_v18, %v2402_v53  ;;  %v1192_v38 = vsel %vm2500_vm1, %v2406_v45, %v1188_v39  ;;  %vm1179_vm5 = vcmp.eq.f32.partialorder %v1178_v37, 8.507059e+37  ;;  %vm1219_vm6 = vweird.f32 %v2402_v53 }
 0x1bd   : > { %1814 = vrcp.f32 %v2448_v44  ;;  %v1200_v52 = vmul.f32 %v2451_v4, %v2404_v54  ;;  %v1177_v56 = vsel %vm2513_vm3, %v2408_v6, %v1173_v61  ;;  %v1196_v6 = vor.u32 1.1754944e-38, %v1195_v22  ;;  %v2752_v61 = vld [vmem:[#allocation19_spill] sm:$0xff] }
 0x1be   : > { %v1216_v62 = vsub.f32 1.0, %v1215_v29  ;;  %vm1205_vm7 = vweird.f32 %v2451_v4  ;;  %vm1220_vm8 = vweird.f32 %v2445_v18  ;;  %vm1204_vm9 = vweird.f32 %v2404_v54 }
 0x1bf   : > { %v939_v21 = vpop.f32.mrf.mxu0  ;;  %v1201_v0 = vsub.f32 1.0, %v1200_v52  ;;  %v1197_v8 = vsel %vm2517_vm4, %v1196_v6, %v1192_v38  ;;  %v1210_v52 = vand.u32 2147483648, %v2404_v54  ;;  %vm2544_vm10 = vmor %vm1219_vm6, %vm1220_vm8  ;;  %v818_v59 = vadd.f32 %v2400_v33, %v663_v20 }
 0x1c0   : > { %v958_v28 = vpop.f32.mrf.mxu1  ;;  %v968_v34 = vadd.f32 %v939_v21, %v813_v7  ;;  %v2489_v17 = vpop.eup %1812  ;;  %v1217_v3 = vmul.f32 %v2445_v18, %v1216_v62  ;;  %vm2555_vm11 = vmor %vm1204_vm9, %vm1205_vm7  ;;  %v1223_v5 = vand.u32 2147483647, %v2402_v53  ;;  %vm1249_vm0 = vweird.f32 %v2441_v24 }
 0x1c1   : > { %v969_v23 = vadd.f32 %v958_v28, %v814_v55  ;;  %v1202_v43 = vmul.f32 %v2451_v4, %v1201_v0  ;;  %v1245_v49 = vmul.f32 %v2489_v17, %v2441_v24  ;;  %v1055_v7 = vpop.permute.xlu0 %1054  ;;  %v1181_v55 = vor.u32 1.1754944e-38, %v1180_v40 }
 0x1c2   : > { %v1067_v25 = vadd.f32 %v1050_v26, %v968_v34  ;;  %v1218_v32 = vadd.f32 %v2445_v18, %v1217_v3  ;;  %v1225_v34 = vand.u32 2147483648, %v2402_v53  ;;  %v1211_v22 = vor.u32 1.1754944e-38, %v1210_v52  ;;  %v1818_v52 = vld [vmem:[%s2189_s12 + $0x8] sm:$0xff] }
 0x1c3   : > { %v1068_v46 = vadd.f32 %v1050_v26, %v969_v23  ;;  %v2493_v13 = vpop.eup %1814  ;;  %v1182_v15 = vsel %vm1179_vm5, %v1181_v55, %v1177_v56  ;;  %v1203_v42 = vadd.f32 %v2451_v4, %v1202_v43  ;;  %v1246_v28 = vsub.f32 1.0, %v1245_v49  ;;  %v1065_v55 = vpop.permute.xlu2 %1064 }
 0x1c4   : > { %v1259_v10 = vmul.f32 %v1152_v51, %v1067_v25  ;;  %v1230_v47 = vmul.f32 %v2493_v13, %v2448_v44  ;;  %v817_v23 = vadd.f32 %v2398_v60, %v662_v36  ;;  %v2749_v25 = vld [vmem:[#allocation21_spill] sm:$0xff]  ;;  %v2751_v60 = vld [vmem:[#allocation22_spill] sm:$0xff]  ;;  %v1222_v36 = vsel %vm2544_vm10, %v2445_v18, %v1218_v32 }
 0x1c5   : > { %v1260_v63 = vmul.f32 %v1167_v11, %v1068_v46  ;;  %v1208_v11 = vand.u32 2147483647, %v2404_v54  ;;  %v2750_v46 = vld [vmem:[#allocation20_spill] sm:$0xff]  ;;  %v463_v33 = vadd.f32 %v2752_v61, %v2751_v60  ;;  %v1207_v62 = vsel %vm2555_vm11, %v2451_v4, %v1203_v42  ;;  %v1816_v32 = vld [vmem:[%s2189_s12 + $0x10] sm:$0xff] }
 0x1c6   : > { %1275 = vrot.lane.b32.xlu0 %v1259_v10, %s2033_s2  ;;  %v1231_v2 = vsub.f32 1.0, %v1230_v47  ;;  %v444_v51 = vadd.f32 %v2750_v46, %v2749_v25  ;;  %v1247_v53 = vmul.f32 %v2489_v17, %v1246_v28  ;;  %v1226_v20 = vor.u32 1.1754944e-38, %v1225_v34  ;;  %v1817_v28 = vld [vmem:[%s2189_s12] sm:$0xff] }
 0x1c7   : > { %1277 = vrot.lane.b32.xlu1 %v1260_v63, %s2033_s2  ;;  %v941_v27 = vpop.f32.mrf.mxu0  ;;  %v665_v40 = vadd.f32 %v2358_v16, %v463_v33  ;;  %vm1209_vm12 = vcmp.eq.f32.partialorder %v1208_v11, 8.507059e+37  ;;  %vm1224_vm13 = vcmp.eq.f32.partialorder %v1223_v5, 8.507059e+37  ;;  %vm1250_vm14 = vweird.f32 %v2489_v17  ;;  %v1820_v5 = vld [vmem:[%s2189_s12 + $0x28] sm:$0xff]  ;;  %v1821_v46 = vld [vmem:[%s2189_s12 + $0x20] sm:$0xff] }
 0x1c8   : > { %v960_v30 = vpop.f32.mrf.mxu1  ;;  %v970_v58 = vadd.f32 %v941_v27, %v815_v19  ;;  %v1232_v10 = vmul.f32 %v2493_v13, %v1231_v2  ;;  %v664_v37 = vadd.f32 %v2356_v12, %v444_v51  ;;  %v1212_v4 = vsel %vm1209_vm12, %v1211_v22, %v1207_v62  ;;  %vm2586_vm1 = vmor %vm1249_vm0, %vm1250_vm14  ;;  %v1822_v33 = vld [vmem:[%s2189_s12 + $0x40] sm:$0xff]  ;;  %v1823_v62 = vld [vmem:[%s2189_s12 + $0x30] sm:$0xff] }
 0x1c9   : > { %v971_v48 = vadd.f32 %v960_v30, %v816_v41  ;;  %v1227_v50 = vsel %vm1224_vm13, %v1226_v20, %v1222_v36  ;;  %vm1235_vm15 = vweird.f32 %v2493_v13  ;;  %v1248_v27 = vadd.f32 %v2489_v17, %v1247_v53  ;;  %v1826_v22 = vld [vmem:[%s2189_s12 + $0x48] sm:$0xff] }
 0x1ca   : > { %v1069_v1 = vadd.f32 %v1055_v7, %v970_v58  ;;  %v1233_v12 = vadd.f32 %v2493_v13, %v1232_v10  ;;  %v819_v16 = vadd.f32 %v2422_v31, %v664_v37  ;;  %v1255_v30 = vand.u32 2147483648, %v2441_v24  ;;  %v1825_v37 = vld [vmem:[%s2189_s12 + $0x58] sm:$0xff] }
 0x1cb   : > { %v1070_v45 = vadd.f32 %v1055_v7, %v971_v48  ;;  %v1240_v56 = vand.u32 2147483648, %v2448_v44  ;;  %v820_v38 = vadd.f32 %v2424_v9, %v665_v40  ;;  %v1253_v3 = vand.u32 2147483647, %v2441_v24 }
 0x1cc   : > { %v1261_v35 = vmul.f32 %v1182_v15, %v1069_v1  ;;  %vm1234_vm3 = vweird.f32 %v2448_v44  ;;  %v1238_v31 = vand.u32 2147483647, %v2448_v44  ;;  %v1252_v47 = vsel %vm2586_vm1, %v2489_v17, %v1248_v27 }
 0x1cd   : > { %v1262_v21 = vmul.f32 %v1197_v8, %v1070_v45  ;;  %vm1236_vm4 = vmor %vm1234_vm3, %vm1235_vm15  ;;  %v1256_v24 = vor.u32 1.1754944e-38, %v1255_v30  ;;  %v1241_v6 = vor.u32 1.1754944e-38, %v1240_v56  ;;  %vm1254_vm5 = vcmp.eq.f32.partialorder %v1253_v3, 8.507059e+37 }
 0x1ce   : > { %1279 = vrot.lane.b32.xlu2 %v1261_v35, %s2033_s2  ;;  %v1237_v7 = vsel %vm1236_vm4, %v2493_v13, %v1233_v12  ;;  %vm1239_vm6 = vcmp.eq.f32.partialorder %v1238_v31, 8.507059e+37  ;;  %vm1291_vm7 = vcmask 15360  }
 0x1cf   : > { %1281 = vrot.lane.b32.xlu0 %v1262_v21, %s2033_s2  ;;  %v944_v39 = vpop.f32.mrf.mxu0  ;;  %v1257_v45 = vsel %vm1254_vm5, %v1256_v24, %v1252_v47  ;;  %v1242_v15 = vsel %vm1239_vm6, %v1241_v6, %v1237_v7 }
 0x1d0   : > { %v963_v0 = vpop.f32.mrf.mxu1  ;;  %v972_v63 = vadd.f32 %v944_v39, %v817_v23 }
 0x1d1   : > { %v973_v54 = vadd.f32 %v963_v0, %v818_v59  ;;  %v1819_v59 = vld [vmem:[%s2189_s12 + $0x18] sm:$0xff] }
 0x1d2   : > { %v1071_v19 = vadd.f32 %v1060_v14, %v972_v63  ;;  %v1824_v63 = vld [vmem:[%s2189_s12 + $0x38] sm:$0xff] }
 0x1d3   : > { %v1072_v41 = vadd.f32 %v1060_v14, %v973_v54 }
 0x1d4   : > { %v1263_v18 = vmul.f32 %v1212_v4, %v1071_v19  ;;  %v1827_v19 = vld [vmem:[%s2189_s12 + $0x50] sm:$0xff]  ;;  %s1640_s12 = sshll.u32 %s2004_s21, 1 }
 0x1d5   : > { %v1264_v57 = vmul.f32 %v1227_v50, %v1072_v41 }
 0x1d6   : > { %1283 = vrot.lane.b32.xlu1 %v1263_v18, %s2033_s2 }
 0x1d7   : > { %1285 = vrot.lane.b32.xlu2 %v1264_v57, %s2033_s2  ;;  %v946_v58 = vpop.f32.mrf.mxu0 }
 0x1d8   : > { %v965_v48 = vpop.f32.mrf.mxu1  ;;  %v974_v9 = vadd.f32 %v946_v58, %v819_v16 }
 0x1d9   : > { %v975_v49 = vadd.f32 %v965_v48, %v820_v38 }
 0x1da   : > { %v1073_v1 = vadd.f32 %v1065_v55, %v974_v9 }
 0x1db   : > { %v1074_v44 = vadd.f32 %v1065_v55, %v975_v49 }
 0x1dc   : > { %v1265_v42 = vmul.f32 %v1242_v15, %v1073_v1 }
 0x1dd   : > { %v1266_v8 = vmul.f32 %v1257_v45, %v1074_v44 }
 0x1de   : > { %1287 = vrot.lane.b32.xlu0 %v1265_v42, %s2033_s2 }
 0x1df   : > { %1289 = vrot.lane.b32.xlu1 %v1266_v8, %s2033_s2 }
 0x228   : > { %v1280_v34 = vpop.permute.xlu2 %1279 }
 0x229   : > { %v1311_v26 = vadd.f32 %v1819_v59, %v1280_v34 }
 0x231   : > { %v1286_v60 = vpop.permute.xlu2 %1285 }
 0x232   : > { %v1316_v39 = vadd.f32 %v1822_v33, %v1286_v60 }
 0x238   : > { %v1276_v13 = vpop.permute.xlu0 %1275 }
 0x239   : > { %v1278_v17 = vpop.permute.xlu1 %1277  ;;  %v1308_v2 = vadd.f32 %v1817_v28, %v1276_v13 }
 0x23a   : > { %v1310_v35 = vadd.f32 %v1816_v32, %v1278_v17  ;;  %v1292_v21 = vsel %vm1291_vm7, %v1276_v13, %v1278_v17 }
 0x23b   : > { %v1309_v29 = vadd.f32 %v1818_v52, %v1292_v21  ;;  %1332 = vrot.lane.b32.xlu2 %v1308_v2, %s2029_s5 }
 0x23c   : > { %1336 = vrot.lane.b32.xlu1 %v1310_v35, %s2029_s5 }
 0x23d   : > { %1334 = vrot.lane.b32.xlu0 %v1309_v29, %s2029_s5 }
 0x241   : > { %v1282_v23 = vpop.permute.xlu0 %1281 }
 0x242   : > { %v1293_v11 = vsel %vm1291_vm7, %v1280_v34, %v1282_v23  ;;  %v1313_v25 = vadd.f32 %v1820_v5, %v1282_v23 }
 0x243   : > { %v1312_v51 = vadd.f32 %v1821_v46, %v1293_v11  ;;  %1338 = vrot.lane.b32.xlu2 %v1311_v26, %s2029_s5 }
 0x244   : > { %1342 = vrot.lane.b32.xlu1 %v1313_v25, %s2029_s5 }
 0x245   : > { %1340 = vrot.lane.b32.xlu0 %v1312_v51, %s2029_s5 }
 0x248   : > { %v1284_v61 = vpop.permute.xlu1 %1283 }
 0x249   : > { %v1294_v0 = vsel %vm1291_vm7, %v1284_v61, %v1286_v60  ;;  %v1314_v36 = vadd.f32 %v1823_v62, %v1284_v61 }
 0x24a   : > { %v1315_v54 = vadd.f32 %v1824_v63, %v1294_v0 }
 0x24b   : > { %1344 = vrot.lane.b32.xlu2 %v1314_v36, %s2029_s5 }
 0x24c   : > { %1348 = vrot.lane.b32.xlu1 %v1316_v39, %s2029_s5 }
 0x24d   : > { %1346 = vrot.lane.b32.xlu0 %v1315_v54, %s2029_s5 }
 0x250   : > { %v1288_v10 = vpop.permute.xlu0 %1287 }
 0x251   : > { %v1290_v53 = vpop.permute.xlu1 %1289  ;;  %v1317_v20 = vadd.f32 %v1826_v22, %v1288_v10 }
 0x252   : > { %v1319_v40 = vadd.f32 %v1825_v37, %v1290_v53  ;;  %v1295_v14 = vsel %vm1291_vm7, %v1288_v10, %v1290_v53 }
 0x253   : > { %v1318_v41 = vadd.f32 %v1827_v19, %v1295_v14  ;;  %1350 = vrot.lane.b32.xlu2 %v1317_v20, %s2029_s5 }
 0x254   : > { %1354 = vrot.lane.b32.xlu1 %v1319_v40, %s2029_s5 }
 0x255   : > { %1352 = vrot.lane.b32.xlu0 %v1318_v41, %s2029_s5  ;;  %s1641_s5 = sshll.u32 %s2008_s22, 4  ;;  %s1396_s22 = sshll.u32 %s2632_s23, 4  ;;  %s2650_s22 = int_to_ptr.vmem [resolvable:$true] %s1396_s22 }
 0x256   : > { %s1393_s25 = sadd.s32 %s1641_s5, %s1640_s12 }
 0x257   : > { %s1642_s28 = sshll.u32 %s1393_s25, 3 }
 0x258   : > { %s1395_s21 = scalar_lea.hbm %s2755_s10, %s1642_s28 }
 0x259   : > { %s1398_s13 = sshll.u32 %s1395_s21, 4  ;;  %s1399_s13 = int_to_ptr.hbm [resolvable:$true] %s1398_s13 }
 0x25a   : > { %s1932_s15 = sshra.s32 %s1399_s13, 4  ;;  %s1933_s15 = int_to_ptr.hbm [resolvable:$true] %s1932_s15 }
 0x25b   : > { %s1934_s16 = scalar_lea.hbm %s1933_s15, 64  ;;  %p1939_p8 = scmp.lt.s32.totalorder %s1933_s15, %s2755_s10 }
 0x25c   : > { %p1935_p1 = scmp.ne.s32.totalorder %s1933_s15, %s1934_s16  ;;  %p1940_p11 = scmp.lt.s32.totalorder %s1938_s27, %s1934_s16 }
 0x25e   : > { %p1936_p2 = pnand %p1935_p1, %p2162_p5  ;;  %p1941_p12 = por %p1940_p11, %p1939_p8 }
 0x260   : > { %p1937_p4 = pneg %p1936_p2 }
 0x262   : > { %p1942_p13 = pnand %p1941_p12, %p1937_p4 }
 0x295   : > { %v1333_v4 = vpop.permute.xlu2 %1332 }
 0x29d   : > { %v1339_v12 = vpop.permute.xlu2 %1338 }
 0x2a5   : > { %v1345_v43 = vpop.permute.xlu2 %1344 }
 0x2ad   : > { %v1351_v49 = vpop.permute.xlu2 %1350 }
 0x2ae   : > { %v1337_v50 = vpop.permute.xlu1 %1336 }
 0x2af   : > { %v1335_v18 = vpop.permute.xlu0 %1334 }
 0x2b0   : > { %v1357_v57 = vsel %vm605_vm2, %v1333_v4, %v1335_v18  ;;  %v1358_v27 = vsel %vm605_vm2, %v1335_v18, %v1337_v50 }
 0x2b1   : > { %1373 = vst [vmem:[%s2632_s23] sm:$0xff] %v1357_v57 }
 0x2b2   : > { %1374 = vst [vmem:[%s2632_s23 + $0x8] sm:$0xff] %v1358_v27 }
 0x2b6   : > { %v1343_v16 = vpop.permute.xlu1 %1342 }
 0x2b7   : > { %v1341_v30 = vpop.permute.xlu0 %1340 }
 0x2b8   : > { %v1359_v56 = vsel %vm605_vm2, %v1339_v12, %v1341_v30  ;;  %v1360_v38 = vsel %vm605_vm2, %v1341_v30, %v1343_v16 }
 0x2b9   : > { %1375 = vst [vmem:[%s2632_s23 + $0x10] sm:$0xff] %v1359_v56 }
 0x2ba   : > { %1376 = vst [vmem:[%s2632_s23 + $0x18] sm:$0xff] %v1360_v38 }
 0x2be   : > { %v1349_v3 = vpop.permute.xlu1 %1348 }
 0x2bf   : > { %v1347_v31 = vpop.permute.xlu0 %1346 }
 0x2c0   : > { %v1361_v58 = vsel %vm605_vm2, %v1345_v43, %v1347_v31  ;;  %v1362_v48 = vsel %vm605_vm2, %v1347_v31, %v1349_v3 }
 0x2c1   : > { %1377 = vst [vmem:[%s2632_s23 + $0x20] sm:$0xff] %v1361_v58 }
 0x2c2   : > { %1378 = vst [vmem:[%s2632_s23 + $0x28] sm:$0xff] %v1362_v48 }
 0x2c6   : > { %v1355_v9 = vpop.permute.xlu1 %1354 }
 0x2c7   : > { %v1353_v47 = vpop.permute.xlu0 %1352 }
 0x2c8   : > { %v1363_v7 = vsel %vm605_vm2, %v1351_v49, %v1353_v47  ;;  %v1364_v55 = vsel %vm605_vm2, %v1353_v47, %v1355_v9 }
 0x2c9   : > { %1379 = vst [vmem:[%s2632_s23 + $0x30] sm:$0xff] %v1363_v7 }
 0x2ca   : > { %1380 = vst [vmem:[%s2632_s23 + $0x38] sm:$0xff] %v1364_v55 }
 0x2cb   : > { %1945 = shalt.err (!%p1942_p13)
}
 0x2cc   : > { %s2034_s1 = smov 256   ;;  %s2035_s11 = smov 512  }
 0x2cd   : > { %s2036_s2 = smov 16  }
 0x2ce   : > { %1679 = dma.vmem_to_hbm [thread:$0]  (%p2162_p5), %s2650_s22, 1024, %s1399_s13, %s1382_s14, %s2034_s1, %s2035_s11, %s2036_s2  }
 0x2cf PF: > { %s2757_s18 = sld [smem:[#allocation14_spill]] }
 0x2d0   : > { %s2758_s23 = sld [smem:[#allocation12_spill]] }
 0x2d5   : > { %p1701_p0 = scmp.ge.s32.totalorder %s2757_s18, 2 }
 0x2d6   : > { %s1413_s5 = sand.u32 1, %s2758_s23  }
 0x2d7   : > { %p1693_p3 = pnand %p1701_p0, %p2126_p6  ;;  %s1414_s25 = scalar_lea.sflag [#allocation4], %s1413_s5 }
 0x2d9   : > { %p1694_p7 = pneg %p1693_p3 }
 0x2db   : > { %1987 = dma.done.wait (%p1694_p7), %s1414_s25, 1024  }
 0x2dc   : > { %1989 = vsyncadd (%p1694_p7), %s1414_s25, 4294966272  ;;  %s22_s25 = sadd.s32 1, %s2757_s18   ;;  %s2760_s21 = sld [smem:[#allocation13_spill]] }
 0x2dd   : > { %p19_p9 = scmp.ge.s32.totalorder %s22_s25, 6   ;;  %s2761_s23 = sld [smem:[#allocation16_spill]] }
 0x2de   : > { %s2762_s28 = sld [smem:[#allocation18_spill]]  ;;  %s2763_s18 = smov %s1996_s19 }
 0x2df   : > { %s2764_s19 = smov %s2000_s20  ;;  %s2765_s20 = smov %s2177_s29 }
 0x2e0   : > { %s2766_s22 = smov %s2016_s24  ;;  %21 = sbr.rel (!%p19_p9) target bundleno = 12 (0xc), region = 101 }
 0x2e4   : > { %s2767_s24 = smov %s2762_s28 }
 0x2e5   :  { %1420 = vsyncpa [#allocation3], 1 }
 0x2e6   :  { %1422 = vsyncpa [#allocation3 + $0x1], 1 }
 0x2e7   :  { %1423 = vsyncpa [#allocation6], 1 }
 0x2e8   :  { %1424 = vsyncpa [#allocation4], 1 }
 0x2e9   :  { %1426 = vsyncpa [#allocation4 + $0x1], 1 }

</bundles_post_ra>
